<compile_context>
chip_gen: v7x
topology: tpu7x:2x2x1
jax: 0.10.0
libtpu: 0.0.40
codegen_flags: <defaults>
</compile_context>

<pallas_src>
import jax
import jax.numpy as jnp
from jax.experimental import pallas as pl
from jax.experimental.pallas import tpu as pltpu


_LANE = 128
_PAD_NEG = -1e9  # sigmoid(_PAD_NEG) == 0 exactly in f32


def _round_up(x, m):
    return (x + m - 1) // m * m


def _round_down(x, m):
    return (x // m) * m


def _iou_kernel(pred_ref, target_ref, iou_ref, inter_acc, union_acc):
    k = pl.program_id(1)

    @pl.when(k == 0)
    def _():
        inter_acc[...] = jnp.zeros_like(inter_acc)
        union_acc[...] = jnp.zeros_like(union_acc)

    x = pred_ref[...].astype(jnp.float32)
    t = target_ref[...].astype(jnp.float32)
    # sigmoid(x) = 0.5 * (tanh(x/2) + 1): one EUP transcendental per element
    p = 0.5 * (jnp.tanh(0.5 * x) + 1.0)

    inter_acc[...] += jnp.sum(p * t, axis=-1, keepdims=True)   # (row_tile, 1)
    union_acc[...] += jnp.sum(p + t, axis=-1, keepdims=True)   # (row_tile, 1)

    @pl.when(k == pl.num_programs(1) - 1)
    def _():
        inter = inter_acc[...]
        union = union_acc[...] - inter
        iou_ref[...] = 1.0 - inter / union


def _choose_tiles(BC, HW, bytes_per_elem, target_block_bytes):
    # 8 rows per sublane group for f32, 16 for bf16 (sublane packing)
    row_align = 8 * (4 // bytes_per_elem)
    hw_lane = _round_up(HW, _LANE)

    rows_in_budget = target_block_bytes // (hw_lane * bytes_per_elem)
    if rows_in_budget >= row_align:
        # whole spatial extent fits in one block column -> single reduction step
        col_tile = hw_lane
        row_tile = _round_down(rows_in_budget, row_align)
    else:
        # very large H*W: tile the spatial axis, keep a minimal row tile
        row_tile = row_align
        col_tile = _round_down(
            target_block_bytes // (row_tile * bytes_per_elem), _LANE)
        col_tile = max(min(col_tile, hw_lane), _LANE)

    row_tile = min(row_tile, _round_up(BC, row_align))
    return row_tile, col_tile


def iou_loss(pred, target, *, target_block_bytes=4 << 20):
    """pred, target: (B, C, H, W) float32/bfloat16 arrays. Returns scalar loss."""
    B, C, H, W = pred.shape
    BC, HW = B * C, H * W
    bpe = jnp.dtype(pred.dtype).itemsize

    row_tile, col_tile = _choose_tiles(BC, HW, bpe, target_block_bytes)
    BC_pad = _round_up(BC, row_tile)
    HW_pad = _round_up(HW, col_tile)

    pred2 = pred.reshape(BC, HW)
    target2 = target.reshape(BC, HW)
    if BC_pad != BC or HW_pad != HW:
        # Padded pred elements -> sigmoid == 0 exactly; padded target == 0,
        # so padding contributes nothing to inter/union of valid rows.
        pred2 = jnp.pad(pred2, ((0, BC_pad - BC), (0, HW_pad - HW)),
                        constant_values=_PAD_NEG)
        target2 = jnp.pad(target2, ((0, BC_pad - BC), (0, HW_pad - HW)),
                          constant_values=0)

    grid = (BC_pad // row_tile, HW_pad // col_tile)
    block_bytes = row_tile * col_tile * bpe
    # 2 inputs x 2 pipeline buffers x block + headroom; clamp to sane range
    vmem_limit = int(min(max(4 * block_bytes + (4 << 20), 16 << 20), 96 << 20))

    per_row_iou = pl.pallas_call(
        _iou_kernel,
        out_shape=jax.ShapeDtypeStruct((BC_pad, 1), jnp.float32),
        grid_spec=pltpu.PrefetchScalarGridSpec(
            num_scalar_prefetch=0,
            grid=grid,
            in_specs=[
                pl.BlockSpec((row_tile, col_tile), lambda i, k: (i, k)),
                pl.BlockSpec((row_tile, col_tile), lambda i, k: (i, k)),
            ],
            out_specs=pl.BlockSpec((row_tile, 1), lambda i, k: (i, 0)),
            scratch_shapes=[
                pltpu.VMEM((row_tile, 1), jnp.float32),
                pltpu.VMEM((row_tile, 1), jnp.float32),
            ],
        ),
        compiler_params=pltpu.CompilerParams(
            dimension_semantics=("parallel", "arbitrary"),
            vmem_limit_bytes=vmem_limit,
        ),
    )(pred2, target2)

    # Mean over the true B*C rows only (padded rows sliced off).
    return jnp.mean(per_row_iou[:BC, 0])


def _iou_ref(pred, target):
    p = jax.nn.sigmoid(pred.astype(jnp.float32))
    t = target.astype(jnp.float32)
    inter = (p * t).sum(axis=(2, 3))
    union = (p + t).sum(axis=(2, 3)) - inter
    return (1.0 - inter / union).mean()


if __name__ == "__main__":
    key = jax.random.PRNGKey(0)

    # Aligned small shape.
    k1, k2, k3, k4 = jax.random.split(key, 4)
    B, C, H, W = 2, 4, 16, 16
    pred = jax.random.normal(k1, (B, C, H, W), dtype=jnp.float32)
    target = (jax.random.uniform(k2, (B, C, H, W)) > 0.5).astype(jnp.float32)
    loss = jax.block_until_ready(iou_loss(pred, target))
    ref = _iou_ref(pred, target)
    assert jnp.allclose(loss, ref, rtol=1e-5, atol=1e-5), (loss, ref)

    # Unaligned shape exercising the row/column padding path.
    B2, C2, H2, W2 = 1, 3, 17, 13
    pred_u = jax.random.normal(k3, (B2, C2, H2, W2), dtype=jnp.float32)
    target_u = (jax.random.uniform(k4, (B2, C2, H2, W2)) > 0.5).astype(jnp.float32)
    loss_u = jax.block_until_ready(iou_loss(pred_u, target_u))
    ref_u = _iou_ref(pred_u, target_u)
    assert jnp.allclose(loss_u, ref_u, rtol=1e-5, atol=1e-5), (loss_u, ref_u)

    print("KERNEL_OK")
</pallas_src>

<mosaic_0001>
module attributes {stable_mosaic.version = 11 : i64} {
  func.func @_iou_kernel(%arg0: i32, %arg1: i32, %arg2: memref<8x256xf32, #tpu.memory_space<vmem>>, %arg3: memref<8x256xf32, #tpu.memory_space<vmem>>, %arg4: memref<8x1xf32, #tpu.memory_space<vmem>>, %arg5: memref<8x1xf32, #tpu.memory_space<vmem>>, %arg6: memref<8x1xf32, #tpu.memory_space<vmem>>) attributes {dimension_semantics = [#tpu.dimension_semantics<parallel>, #tpu.dimension_semantics<arbitrary>], iteration_bounds = array<i64: 1, 1>, scalar_prefetch = 0 : i64, scratch_operands = 2 : i64, tpu.core_type = #tpu.core_type<tc>, window_params = [{transform_indices = @transform_0, window_bounds = array<i64: 8, 256>}, {transform_indices = @transform_1, window_bounds = array<i64: 8, 256>}, {transform_indices = @transform_2, window_bounds = array<i64: 8, 1>}]} {
    %c0_i32 = arith.constant 0 : i32
    %0 = arith.cmpi eq, %arg1, %c0_i32 : i32
    %1 = arith.extui %0 : i1 to i32
    %c0_i32_0 = arith.constant 0 : i32
    %2 = arith.cmpi ne, %1, %c0_i32_0 : i32
    scf.if %2 {
      %cst_18 = arith.constant 0.000000e+00 : f32
      %27 = vector.broadcast %cst_18 : f32 to vector<8x1xf32>
      %c0_19 = arith.constant 0 : index
      %c0_20 = arith.constant 0 : index
      %28 = vector.load %arg5[%c0_19, %c0_20] : memref<8x1xf32, #tpu.memory_space<vmem>>, vector<8x1xf32>
      tpu.vector_store %arg5[%c0_19, %c0_20], %27 {strides = array<i32>} : memref<8x1xf32, #tpu.memory_space<vmem>>, vector<8x1xf32>,
      %cst_21 = arith.constant 0.000000e+00 : f32
      %29 = vector.broadcast %cst_21 : f32 to vector<8x1xf32>
      %c0_22 = arith.constant 0 : index
      %c0_23 = arith.constant 0 : index
      %30 = vector.load %arg6[%c0_22, %c0_23] : memref<8x1xf32, #tpu.memory_space<vmem>>, vector<8x1xf32>
      tpu.vector_store %arg6[%c0_22, %c0_23], %29 {strides = array<i32>} : memref<8x1xf32, #tpu.memory_space<vmem>>, vector<8x1xf32>,
    } else {
    }
    %c0 = arith.constant 0 : index
    %c0_1 = arith.constant 0 : index
    %3 = vector.load %arg2[%c0, %c0_1] : memref<8x256xf32, #tpu.memory_space<vmem>>, vector<8x256xf32>
    %c0_2 = arith.constant 0 : index
    %c0_3 = arith.constant 0 : index
    %4 = vector.load %arg3[%c0_2, %c0_3] : memref<8x256xf32, #tpu.memory_space<vmem>>, vector<8x256xf32>
    %cst = arith.constant 5.000000e-01 : f32
    %5 = vector.broadcast %cst : f32 to vector<8x256xf32>
    %6 = arith.mulf %5, %3 : vector<8x256xf32>
    %7 = math.tanh %6 : vector<8x256xf32>
    %cst_4 = arith.constant 1.000000e+00 : f32
    %8 = vector.broadcast %cst_4 : f32 to vector<8x256xf32>
    %9 = arith.addf %7, %8 : vector<8x256xf32>
    %cst_5 = arith.constant 5.000000e-01 : f32
    %10 = vector.broadcast %cst_5 : f32 to vector<8x256xf32>
    %11 = arith.mulf %10, %9 : vector<8x256xf32>
    %c0_6 = arith.constant 0 : index
    %c0_7 = arith.constant 0 : index
    %12 = vector.load %arg5[%c0_6, %c0_7] : memref<8x1xf32, #tpu.memory_space<vmem>>, vector<8x1xf32>
    %13 = arith.mulf %11, %4 : vector<8x256xf32>
    %cst_8 = arith.constant dense<0.000000e+00> : vector<8xf32>
    %14 = vector.multi_reduction <add>, %13, %cst_8 [1] : vector<8x256xf32> to vector<8xf32>
    %15 = vector.shape_cast %14 : vector<8xf32> to vector<8x1xf32>
    %16 = arith.addf %12, %15 : vector<8x1xf32>
    %c0_9 = arith.constant 0 : index
    %c0_10 = arith.constant 0 : index
    %17 = vector.load %arg5[%c0_9, %c0_10] : memref<8x1xf32, #tpu.memory_space<vmem>>, vector<8x1xf32>
    tpu.vector_store %arg5[%c0_9, %c0_10], %16 {strides = array<i32>} : memref<8x1xf32, #tpu.memory_space<vmem>>, vector<8x1xf32>,
    %c0_11 = arith.constant 0 : index
    %c0_12 = arith.constant 0 : index
    %18 = vector.load %arg6[%c0_11, %c0_12] : memref<8x1xf32, #tpu.memory_space<vmem>>, vector<8x1xf32>
    %19 = arith.addf %11, %4 : vector<8x256xf32>
    %cst_13 = arith.constant dense<0.000000e+00> : vector<8xf32>
    %20 = vector.multi_reduction <add>, %19, %cst_13 [1] : vector<8x256xf32> to vector<8xf32>
    %21 = vector.shape_cast %20 : vector<8xf32> to vector<8x1xf32>
    %22 = arith.addf %18, %21 : vector<8x1xf32>
    %c0_14 = arith.constant 0 : index
    %c0_15 = arith.constant 0 : index
    %23 = vector.load %arg6[%c0_14, %c0_15] : memref<8x1xf32, #tpu.memory_space<vmem>>, vector<8x1xf32>
    tpu.vector_store %arg6[%c0_14, %c0_15], %22 {strides = array<i32>} : memref<8x1xf32, #tpu.memory_space<vmem>>, vector<8x1xf32>,
    %c0_i32_16 = arith.constant 0 : i32
    %24 = arith.cmpi eq, %arg1, %c0_i32_16 : i32
    %25 = arith.extui %24 : i1 to i32
    %c0_i32_17 = arith.constant 0 : i32
    %26 = arith.cmpi ne, %25, %c0_i32_17 : i32
    scf.if %26 {
      %c0_18 = arith.constant 0 : index
      %c0_19 = arith.constant 0 : index
      %27 = vector.load %arg5[%c0_18, %c0_19] : memref<8x1xf32, #tpu.memory_space<vmem>>, vector<8x1xf32>
      %c0_20 = arith.constant 0 : index
      %c0_21 = arith.constant 0 : index
      %28 = vector.load %arg6[%c0_20, %c0_21] : memref<8x1xf32, #tpu.memory_space<vmem>>, vector<8x1xf32>
      %29 = arith.subf %28, %27 : vector<8x1xf32>
      %30 = arith.divf %27, %29 : vector<8x1xf32>
      %cst_22 = arith.constant 1.000000e+00 : f32
      %31 = vector.broadcast %cst_22 : f32 to vector<8x1xf32>
      %32 = arith.subf %31, %30 : vector<8x1xf32>
      %c0_23 = arith.constant 0 : index
      %c0_24 = arith.constant 0 : index
      %33 = vector.load %arg4[%c0_23, %c0_24] : memref<8x1xf32, #tpu.memory_space<vmem>>, vector<8x1xf32>
      tpu.vector_store %arg4[%c0_23, %c0_24], %32 {strides = array<i32>} : memref<8x1xf32, #tpu.memory_space<vmem>>, vector<8x1xf32>,
    } else {
    }
    return
  }
  func.func @transform_0(%arg0: i32, %arg1: i32) -> (i32, i32) {
    %c0_i32 = arith.constant 0 : i32
    return %arg0, %arg1 : i32, i32
  }
  func.func @transform_1(%arg0: i32, %arg1: i32) -> (i32, i32) {
    %c0_i32 = arith.constant 0 : i32
    return %arg0, %arg1 : i32, i32
  }
  func.func @transform_2(%arg0: i32, %arg1: i32) -> (i32, i32) {
    %c0_i32 = arith.constant 0 : i32
    %c0_i32_0 = arith.constant 0 : i32
    return %arg0, %c0_i32 : i32, i32
  }
}

</mosaic_0001>

<bundles_post_ra>
// kernel: tpu_custom_call.1
= control target key start
LH: loop header
LB: loop body
LE: loop exit
PB: predicated region body
PF: predicated region fallthrough
CT: control target
= control target key end

     0   :  { %7 = vsyncpa [#allocation5], 0  ;;  %s194_s0 = inlined_call_operand.hbm [shape: f32[8,256], index: 0, kind: input, shape index: {}]   ;;  %s195_s1 = inlined_call_operand.hbm [shape: f32[8,256], index: 1, kind: input, shape index: {}]   ;;  %s196_s2 = inlined_call_operand.vmem [shape: f32[8,1], index: 2, kind: output, shape index: {}]  }
   0x1   :  { %8 = vsyncpa [#allocation7], 0  ;;  %s144_s9 = smov [#allocation4]   ;;  %s145_s11 = smov [#allocation6]  }
   0x2   :  { %s15_s10 = sshll.u32 %s144_s9, 4  ;;  %s25_s12 = sshll.u32 %s145_s11, 4  ;;  %s16_s10 = int_to_ptr.vmem [resolvable:$true] %s15_s10  ;;  %s26_s12 = int_to_ptr.vmem [resolvable:$true] %s25_s12 }
   0x3   :  { %s96_s15 = scalar_lea.hbm %s194_s0, 256 }
   0x4   :  { %p97_p0 = scmp.ne.s32.totalorder %s194_s0, %s96_s15  ;;  %p100_p1 = scmp.lt.u32.totalorder %s96_s15, %s194_s0 }
   0x6   :  { %p102_p2 = pnand %p100_p1, %p97_p0 }
   0x8   :  { %105 = shalt.err (!%p102_p2)
}
   0x9   :  { %s106_s20 = scalar_lea.vmem %s16_s10, 256  ;;  %p111_p4 = scmp.lt.s32.totalorder %s16_s10, %s16_s10 }
   0xa   :  { %p107_p3 = scmp.ne.s32.totalorder %s16_s10, %s106_s20  ;;  %p112_p5 = scmp.lt.s32.totalorder %s106_s20, %s106_s20 }
   0xc   :  { %p113_p6 = por %p112_p5, %p111_p4 }
   0xe   :  { %p114_p7 = pnand %p113_p6, %p107_p3 }
  0x10   :  { %117 = shalt.err (!%p114_p7)
}
  0x11   :  { %18 = dma.hbm_to_vmem [thread:$0]  %s194_s0, 256, %s16_s10, [#allocation5]  }
  0x12   :  { %s118_s25 = scalar_lea.hbm %s195_s1, 256 }
  0x13   :  { %p119_p8 = scmp.ne.s32.totalorder %s195_s1, %s118_s25  ;;  %p122_p9 = scmp.lt.u32.totalorder %s118_s25, %s195_s1 }
  0x15   :  { %p124_p10 = pnand %p122_p9, %p119_p8 }
  0x17   :  { %127 = shalt.err (!%p124_p10)
}
  0x18   :  { %s128_s30 = scalar_lea.vmem %s26_s12, 256  ;;  %p133_p12 = scmp.lt.s32.totalorder %s26_s12, %s26_s12 }
  0x19   :  { %p129_p11 = scmp.ne.s32.totalorder %s26_s12, %s128_s30  ;;  %p134_p13 = scmp.lt.s32.totalorder %s128_s30, %s128_s30 }
  0x1b   :  { %p135_p0 = por %p134_p13, %p133_p12 }
  0x1d   :  { %p136_p1 = pnand %p135_p0, %p129_p11 }
  0x1f   :  { %139 = shalt.err (!%p136_p1)
}
  0x20   :  { %28 = dma.hbm_to_vmem [thread:$0]  %s195_s1, 256, %s26_s12, [#allocation7]  }
  0x21   :  { %140 = dma.done.wait [#allocation5], 256  }
  0x22   :  { %141 = vsyncadd [#allocation5], 4294967040 }
  0x23   :  { %142 = dma.done.wait [#allocation7], 256  }
  0x24   :  { %143 = vsyncadd [#allocation7], 4294967040  ;;  %vm39_vm0 = vcmask 7168   ;;  %v146_v0 = vmov 0.0   ;;  %v42_v1 = vld [vmem:[#allocation4] sm:$0xff]  ;;  %v43_v2 = vld [vmem:[#allocation4 + $0x8] sm:$0xff] }
  0x25   :  { %40 = vst.msk [vmem:[#allocation2] sm:$0xff] %vm39_vm0, %v146_v0  ;;  %41 = vst.msk [vmem:[#allocation3] sm:$0xff] %vm39_vm0, %v146_v0  ;;  %v46_v3 = vmul.f32 0.5, %v42_v1  ;;  %v47_v4 = vmul.f32 0.5, %v43_v2  ;;  %v44_v8 = vld [vmem:[#allocation6] sm:$0xff]  ;;  %v45_v10 = vld [vmem:[#allocation6 + $0x8] sm:$0xff] }
  0x27   :  { %90 = vtanh.f32 %v46_v3 }
  0x28   :  { %92 = vtanh.f32 %v47_v4 }
  0x2c   :  { %v54_v19 = vld [vmem:[#allocation2] sm:$0xff]  ;;  %v63_v22 = vld [vmem:[#allocation3] sm:$0xff] }
  0x31   :  { %v91_v5 = vpop.eup %90 }
  0x32   :  { %v93_v6 = vpop.eup %92  ;;  %v50_v7 = vadd.f32 1.0, %v91_v5 }
  0x33   :  { %v51_v9 = vadd.f32 1.0, %v93_v6 }
  0x34   :  { %v52_v11 = vmul.f32 0.5, %v50_v7 }
  0x35   :  { %v53_v12 = vmul.f32 0.5, %v51_v9 }
  0x36   :  { %v55_v13 = vmul.f32 %v52_v11, %v44_v8  ;;  %v64_v15 = vadd.f32 %v52_v11, %v44_v8 }
  0x37   :  { %v56_v14 = vmul.f32 %v53_v12, %v45_v10  ;;  %v65_v16 = vadd.f32 %v53_v12, %v45_v10 }
  0x39   :  { %v57_v17 = vadd.f32 %v56_v14, %v55_v13  ;;  %v66_v18 = vadd.f32 %v65_v16, %v64_v15 }
  0x3b   :  { %58 = vadd.xlane.f32.xlu0 %v57_v17 }
  0x3f   :  { %67 = vadd.xlane.f32.xlu0 %v66_v18 }
  0xc8   :  { %v59_v20 = vpop.xlane.xlu0 %58 }
  0xc9   :  { %v60_v21 = vadd.f32 %v59_v20, %v54_v19 }
  0xcb   :  { %62 = vst.msk [vmem:[#allocation2] sm:$0xff] %vm39_vm0, %v60_v21 }
  0xcc   :  { %v68_v23 = vpop.xlane.xlu0 %67 }
  0xcd   :  { %v69_v24 = vadd.f32 %v68_v23, %v63_v22 }
  0xcf   :  { %70 = vst.msk [vmem:[#allocation3] sm:$0xff] %vm39_vm0, %v69_v24 }
  0xd2   :  { %v74_v25 = vld [vmem:[#allocation2] sm:$0xff] }
  0xd6   :  { %v75_v26 = vld [vmem:[#allocation3] sm:$0xff] }
  0xd7   :  { %v76_v27 = vsub.f32 %v75_v26, %v74_v25 }
  0xd9   :  { %94 = vrcp.f32 %v76_v27 }
  0xe3   :  { %v95_v28 = vpop.eup %94 }
  0xe4   :  { %v78_v29 = vmul.f32 %v95_v28, %v74_v25 }
  0xe6   :  { %v79_v30 = vsub.f32 1.0, %v78_v29 }
  0xe8   :  { %80 = vst.msk [vmem:[%s196_s2] sm:$0xff] %vm39_vm0, %v79_v30 }
  0xe9   :  { %85 = vsyncpa [#allocation5], 1 }
  0xea   :  { %86 = vsyncpa [#allocation7], 1 }

</bundles_post_ra>
